<compile_context>
chip_gen: v5e
topology: v5e:2x2
jax: 0.10.0
libtpu: 0.0.40
codegen_flags: <defaults>
</compile_context>

<pallas_src>
import jax
import jax.numpy as jnp
from jax.experimental import pallas as pl
from jax.experimental.pallas import tpu as pltpu

INPUT_SIZE = 768
H1 = 128
H2 = 128
OUT = 1
W3_PAD = 128           # fc3 weight padded to a full MXU lane width
MAX_TB = 1024          # batch tile rows: 1024 * 768 * 4 B = 3 MiB per f32 x tile


def _round_up(n, m):
    return ((n + m - 1) // m) * m


def critic_kernel(x_ref, w1_ref, b1_ref, w2_ref, b2_ref, w3_ref, b3_ref, o_ref):
    # x arrives as f32 (no wrapper-side cast pass over HBM); cast to bf16 on the
    # VPU just before the MXU.
    x = x_ref[...].astype(jnp.bfloat16)
    # fc1 + ReLU   (bf16 operands, f32 MXU accumulation; bias/ReLU stay in f32)
    h1 = jnp.dot(x, w1_ref[...], preferred_element_type=jnp.float32)
    h1 = jnp.maximum(h1 + b1_ref[...], 0.0)
    # fc2 + ReLU
    h2 = jnp.dot(h1.astype(jnp.bfloat16), w2_ref[...],
                 preferred_element_type=jnp.float32)
    h2 = jnp.maximum(h2 + b2_ref[...], 0.0)
    # fc3: W3 zero-padded to 128 columns for a full-width MXU op; only column 0
    # is real.  Narrow in-register so only (TB, 1) f32 goes back to HBM.
    h3 = jnp.dot(h2.astype(jnp.bfloat16), w3_ref[...],
                 preferred_element_type=jnp.float32)
    o_ref[...] = h3[:, :OUT] + b3_ref[...]


@jax.jit
def critic_forward(x, params):
    """x: (B, INPUT_SIZE) float32 -> (B, 1) float32."""
    w1, b1, w2, b2, w3, b3 = params
    B = x.shape[0]

    # Batch tiling: single tile (rounded to 8 sublanes) for small batches,
    # otherwise fixed MAX_TB tiles with the batch padded to a whole tile count.
    if B <= MAX_TB:
        TB = _round_up(max(B, 1), 8)
        Bp = TB
    else:
        TB = MAX_TB
        Bp = _round_up(B, TB)
    if Bp != B:
        x = jnp.pad(x, ((0, Bp - B), (0, 0)))

    # Weights in bf16 for the MXU (tiny one-off casts); biases stay f32 and are
    # added to the f32 accumulator.  W3 is lane-padded; b3 stays (1, 1).
    w1_bf = w1.astype(jnp.bfloat16)
    w2_bf = w2.astype(jnp.bfloat16)
    w3_bf = jnp.pad(w3, ((0, 0), (0, W3_PAD - OUT))).astype(jnp.bfloat16)

    grid = (Bp // TB,)

    def const(shape):
        return pl.BlockSpec(shape, lambda i: (0, 0))

    flops = 2 * Bp * (INPUT_SIZE * H1 + H1 * H2 + H2 * W3_PAD)
    bytes_accessed = (
        Bp * INPUT_SIZE * 4                       # x (f32, read once by kernel)
        + (w1_bf.size + w2_bf.size + w3_bf.size) * 2
        + (b1.size + b2.size + b3.size) * 4
        + Bp * OUT * 4                            # narrow f32 writeback
    )

    out = pl.pallas_call(
        critic_kernel,
        out_shape=jax.ShapeDtypeStruct((Bp, OUT), jnp.float32),
        grid=grid,
        in_specs=[
            pl.BlockSpec((TB, INPUT_SIZE), lambda i: (i, 0)),   # x tile (streamed)
            const((INPUT_SIZE, H1)),                            # W1 (resident)
            const((1, H1)),                                     # b1
            const((H1, H2)),                                    # W2
            const((1, H2)),                                     # b2
            const((H2, W3_PAD)),                                # W3 (lane-padded)
            const((1, OUT)),                                    # b3
        ],
        out_specs=pl.BlockSpec((TB, OUT), lambda i: (i, 0)),
        compiler_params=pltpu.CompilerParams(
            dimension_semantics=("parallel",),        # megacore sharding
            vmem_limit_bytes=32 * 1024 * 1024,
        ),
        cost_estimate=pl.CostEstimate(
            flops=flops, transcendentals=0, bytes_accessed=bytes_accessed),
    )(x, w1_bf, b1, w2_bf, b2, w3_bf, b3)

    return out[:B]


def init_params(key):
    """PyTorch-like nn.Linear init (uniform +-1/sqrt(fan_in)); weights stored
    transposed as (in_features, out_features), biases as (1, out_features)."""
    def linear(k, fan_in, fan_out):
        kw, kb = jax.random.split(k)
        bound = 1.0 / jnp.sqrt(fan_in)
        w = jax.random.uniform(kw, (fan_in, fan_out), jnp.float32, -bound, bound)
        b = jax.random.uniform(kb, (1, fan_out), jnp.float32, -bound, bound)
        return w, b

    k1, k2, k3 = jax.random.split(key, 3)
    w1, b1 = linear(k1, INPUT_SIZE, H1)
    w2, b2 = linear(k2, H1, H2)
    w3, b3 = linear(k3, H2, OUT)
    return (w1, b1, w2, b2, w3, b3)


def reference_forward(x, params):
    """Pure-JAX f32 reference of the PyTorch forward."""
    w1, b1, w2, b2, w3, b3 = params
    h = jnp.maximum(x @ w1 + b1, 0.0)
    h = jnp.maximum(h @ w2 + b2, 0.0)
    return h @ w3 + b3


if __name__ == "__main__":
    key = jax.random.PRNGKey(0)
    kp, kx = jax.random.split(key)
    params = init_params(kp)

    B = 8  # small batch for the smoke test
    x = jax.random.normal(kx, (B, INPUT_SIZE), dtype=jnp.float32)

    out = critic_forward(x, params)
    out = jax.block_until_ready(out)

    ref = reference_forward(x, params)
    assert out.shape == (B, 1)
    # bf16 operands with f32 accumulation: compare against the f32 reference
    # with a tolerance that covers bf16 rounding of x and the weights.
    assert jnp.allclose(out, ref, atol=2e-2, rtol=2e-2), (
        f"max abs err {jnp.max(jnp.abs(out - ref))}")

    print("KERNEL_OK")
</pallas_src>

<mosaic_0001>
module attributes {stable_mosaic.version = 11 : i64} {
  func.func @critic_kernel(%arg0: i32, %arg1: memref<8x768xf32, #tpu.memory_space<vmem>>, %arg2: memref<768x128xbf16, #tpu.memory_space<vmem>>, %arg3: memref<1x128xf32, #tpu.memory_space<vmem>>, %arg4: memref<128x128xbf16, #tpu.memory_space<vmem>>, %arg5: memref<1x128xf32, #tpu.memory_space<vmem>>, %arg6: memref<128x128xbf16, #tpu.memory_space<vmem>>, %arg7: memref<1x1xf32, #tpu.memory_space<vmem>>, %arg8: memref<8x1xf32, #tpu.memory_space<vmem>>) attributes {dimension_semantics = [#tpu.dimension_semantics<parallel>], iteration_bounds = array<i64: 1>, scalar_prefetch = 0 : i64, scratch_operands = 0 : i64, tpu.core_type = #tpu.core_type<tc>, window_params = [{transform_indices = @transform_0, window_bounds = array<i64: 8, 768>}, {pipeline_mode = #tpu.pipeline_mode<synchronous>, transform_indices = @transform_1, window_bounds = array<i64: 768, 128>}, {pipeline_mode = #tpu.pipeline_mode<synchronous>, transform_indices = @transform_2, window_bounds = array<i64: 1, 128>}, {pipeline_mode = #tpu.pipeline_mode<synchronous>, transform_indices = @transform_3, window_bounds = array<i64: 128, 128>}, {pipeline_mode = #tpu.pipeline_mode<synchronous>, transform_indices = @transform_4, window_bounds = array<i64: 1, 128>}, {pipeline_mode = #tpu.pipeline_mode<synchronous>, transform_indices = @transform_5, window_bounds = array<i64: 128, 128>}, {pipeline_mode = #tpu.pipeline_mode<synchronous>, transform_indices = @transform_6, window_bounds = array<i64: 1, 1>}, {transform_indices = @transform_7, window_bounds = array<i64: 8, 1>}]} {
    %c0 = arith.constant 0 : index
    %c0_0 = arith.constant 0 : index
    %0 = vector.load %arg1[%c0, %c0_0] : memref<8x768xf32, #tpu.memory_space<vmem>>, vector<8x768xf32>
    %1 = arith.truncf %0 : vector<8x768xf32> to vector<8x768xbf16>
    %c0_1 = arith.constant 0 : index
    %c0_2 = arith.constant 0 : index
    %2 = vector.load %arg2[%c0_1, %c0_2] : memref<768x128xbf16, #tpu.memory_space<vmem>>, vector<768x128xbf16>
    %cst = arith.constant dense<0.000000e+00> : vector<8x128xf32>
    %3 = tpu.matmul %1, %2, %cst {dimension_numbers = #tpu.dot_dimension_numbers<[1], [0], [0], [1], [0, 0, 1, 1], [], []>} : vector<8x768xbf16>, vector<768x128xbf16>, vector<8x128xf32> -> vector<8x128xf32>
    %c0_3 = arith.constant 0 : index
    %c0_4 = arith.constant 0 : index
    %4 = vector.load %arg3[%c0_3, %c0_4] : memref<1x128xf32, #tpu.memory_space<vmem>>, vector<1x128xf32>
    %5 = vector.broadcast %4 : vector<1x128xf32> to vector<8x128xf32>
    %6 = arith.addf %3, %5 : vector<8x128xf32>
    %cst_5 = arith.constant 0.000000e+00 : f32
    %7 = vector.broadcast %cst_5 : f32 to vector<8x128xf32>
    %8 = arith.maximumf %6, %7 : vector<8x128xf32>
    %9 = arith.truncf %8 : vector<8x128xf32> to vector<8x128xbf16>
    %c0_6 = arith.constant 0 : index
    %c0_7 = arith.constant 0 : index
    %10 = vector.load %arg4[%c0_6, %c0_7] : memref<128x128xbf16, #tpu.memory_space<vmem>>, vector<128x128xbf16>
    %cst_8 = arith.constant dense<0.000000e+00> : vector<8x128xf32>
    %11 = tpu.matmul %9, %10, %cst_8 {dimension_numbers = #tpu.dot_dimension_numbers<[1], [0], [0], [1], [0, 0, 1, 1], [], []>} : vector<8x128xbf16>, vector<128x128xbf16>, vector<8x128xf32> -> vector<8x128xf32>
    %c0_9 = arith.constant 0 : index
    %c0_10 = arith.constant 0 : index
    %12 = vector.load %arg5[%c0_9, %c0_10] : memref<1x128xf32, #tpu.memory_space<vmem>>, vector<1x128xf32>
    %13 = vector.broadcast %12 : vector<1x128xf32> to vector<8x128xf32>
    %14 = arith.addf %11, %13 : vector<8x128xf32>
    %cst_11 = arith.constant 0.000000e+00 : f32
    %15 = vector.broadcast %cst_11 : f32 to vector<8x128xf32>
    %16 = arith.maximumf %14, %15 : vector<8x128xf32>
    %17 = arith.truncf %16 : vector<8x128xf32> to vector<8x128xbf16>
    %c0_12 = arith.constant 0 : index
    %c0_13 = arith.constant 0 : index
    %18 = vector.load %arg6[%c0_12, %c0_13] : memref<128x128xbf16, #tpu.memory_space<vmem>>, vector<128x128xbf16>
    %cst_14 = arith.constant dense<0.000000e+00> : vector<8x128xf32>
    %19 = tpu.matmul %17, %18, %cst_14 {dimension_numbers = #tpu.dot_dimension_numbers<[1], [0], [0], [1], [0, 0, 1, 1], [], []>} : vector<8x128xbf16>, vector<128x128xbf16>, vector<8x128xf32> -> vector<8x128xf32>
    %20 = vector.extract_strided_slice %19 {offsets = [0, 0], sizes = [8, 1], strides = [1, 1]} : vector<8x128xf32> to vector<8x1xf32>
    %c0_15 = arith.constant 0 : index
    %c0_16 = arith.constant 0 : index
    %21 = vector.load %arg7[%c0_15, %c0_16] : memref<1x1xf32, #tpu.memory_space<vmem>>, vector<1x1xf32>
    %22 = vector.broadcast %21 : vector<1x1xf32> to vector<8x1xf32>
    %23 = arith.addf %20, %22 : vector<8x1xf32>
    %c0_17 = arith.constant 0 : index
    %c0_18 = arith.constant 0 : index
    %24 = vector.load %arg8[%c0_17, %c0_18] : memref<8x1xf32, #tpu.memory_space<vmem>>, vector<8x1xf32>
    tpu.vector_store %arg8[%c0_17, %c0_18], %23 {strides = array<i32>} : memref<8x1xf32, #tpu.memory_space<vmem>>, vector<8x1xf32>,
    return
  }
  func.func @transform_0(%arg0: i32) -> (i32, i32) {
    %c0_i32 = arith.constant 0 : i32
    %c0_i32_0 = arith.constant 0 : i32
    return %arg0, %c0_i32 : i32, i32
  }
  func.func @transform_1(%arg0: i32) -> (i32, i32) {
    %c0_i32 = arith.constant 0 : i32
    %c0_i32_0 = arith.constant 0 : i32
    %c0_i32_1 = arith.constant 0 : i32
    return %c0_i32, %c0_i32_0 : i32, i32
  }
  func.func @transform_2(%arg0: i32) -> (i32, i32) {
    %c0_i32 = arith.constant 0 : i32
    %c0_i32_0 = arith.constant 0 : i32
    %c0_i32_1 = arith.constant 0 : i32
    return %c0_i32, %c0_i32_0 : i32, i32
  }
  func.func @transform_3(%arg0: i32) -> (i32, i32) {
    %c0_i32 = arith.constant 0 : i32
    %c0_i32_0 = arith.constant 0 : i32
    %c0_i32_1 = arith.constant 0 : i32
    return %c0_i32, %c0_i32_0 : i32, i32
  }
  func.func @transform_4(%arg0: i32) -> (i32, i32) {
    %c0_i32 = arith.constant 0 : i32
    %c0_i32_0 = arith.constant 0 : i32
    %c0_i32_1 = arith.constant 0 : i32
    return %c0_i32, %c0_i32_0 : i32, i32
  }
  func.func @transform_5(%arg0: i32) -> (i32, i32) {
    %c0_i32 = arith.constant 0 : i32
    %c0_i32_0 = arith.constant 0 : i32
    %c0_i32_1 = arith.constant 0 : i32
    return %c0_i32, %c0_i32_0 : i32, i32
  }
  func.func @transform_6(%arg0: i32) -> (i32, i32) {
    %c0_i32 = arith.constant 0 : i32
    %c0_i32_0 = arith.constant 0 : i32
    %c0_i32_1 = arith.constant 0 : i32
    return %c0_i32, %c0_i32_0 : i32, i32
  }
  func.func @transform_7(%arg0: i32) -> (i32, i32) {
    %c0_i32 = arith.constant 0 : i32
    %c0_i32_0 = arith.constant 0 : i32
    return %arg0, %c0_i32 : i32, i32
  }
}

</mosaic_0001>

<bundles_post_ra>
// kernel: critic_forward.1
= control target key start
LH: loop header
LB: loop body
LE: loop exit
PB: predicated region body
PF: predicated region fallthrough
CT: control target
= control target key end

     0   :  { %vm673_vm0 = vcmask 7168   ;;  %s1264_s1 = inlined_call_operand.vmem [shape: bf16[768,128], index: 1, kind: input, shape index: {}]   ;;  %s1265_s2 = inlined_call_operand.vmem [shape: f32[1,128], index: 2, kind: input, shape index: {}]   ;;  %s1266_s0 = inlined_call_operand.vmem [shape: f32[8,768], index: 0, kind: input, shape index: {}]   ;;  %s1267_s4 = inlined_call_operand.vmem [shape: f32[1,128], index: 4, kind: input, shape index: {}]   ;;  %s1268_s3 = inlined_call_operand.vmem [shape: bf16[128,128], index: 3, kind: input, shape index: {}]   ;;  %s1269_s5 = inlined_call_operand.vmem [shape: bf16[128,128], index: 5, kind: input, shape index: {}]   ;;  %s1270_s6 = inlined_call_operand.<no memory space> [shape: f32[1,1], index: 6, kind: input, shape index: {}]   ;;  %s1271_s7 = inlined_call_operand.vmem [shape: f32[8,1], index: 7, kind: output, shape index: {}]  }
   0x1   :  { %v942_v0 = vld [vmem:[%s1264_s1 + $0x38] sm:$0xff]  ;;  %v941_v2 = vld [vmem:[%s1264_s1 + $0x30] sm:$0xff]  ;;  %v940_v8 = vld [vmem:[%s1264_s1 + $0x28] sm:$0xff] }
   0x2   :  { %v950_v1 = vld [vmem:[%s1264_s1 + $0x78] sm:$0xff]  ;;  %428 = vmatpush.bf16.msra.mxu0 %v942_v0  ;;  %v949_v3 = vld [vmem:[%s1264_s1 + $0x70] sm:$0xff]  ;;  %v948_v9 = vld [vmem:[%s1264_s1 + $0x68] sm:$0xff] }
   0x3   :  { %441 = vmatpush.bf16.msra.mxu1 %v950_v1  ;;  %v958_v4 = vld [vmem:[%s1264_s1 + $0xb8] sm:$0xff]  ;;  %v957_v6 = vld [vmem:[%s1264_s1 + $0xb0] sm:$0xff]  ;;  %v956_v10 = vld [vmem:[%s1264_s1 + $0xa8] sm:$0xff] }
   0x4   :  { %v966_v5 = vld [vmem:[%s1264_s1 + $0xf8] sm:$0xff]  ;;  %454 = vmatpush.bf16.msra.mxu2 %v958_v4  ;;  %v965_v7 = vld [vmem:[%s1264_s1 + $0xf0] sm:$0xff]  ;;  %v964_v11 = vld [vmem:[%s1264_s1 + $0xe8] sm:$0xff] }
   0x5   :  { %467 = vmatpush.bf16.msra.mxu3 %v966_v5  ;;  %v939_v12 = vld [vmem:[%s1264_s1 + $0x20] sm:$0xff]  ;;  %v938_v16 = vld [vmem:[%s1264_s1 + $0x18] sm:$0xff]  ;;  %v937_v20 = vld [vmem:[%s1264_s1 + $0x10] sm:$0xff] }
   0x6   :  { %429 = vmatpush.bf16.msra.mxu0 %v941_v2  ;;  %v947_v13 = vld [vmem:[%s1264_s1 + $0x60] sm:$0xff]  ;;  %v946_v17 = vld [vmem:[%s1264_s1 + $0x58] sm:$0xff]  ;;  %v945_v21 = vld [vmem:[%s1264_s1 + $0x50] sm:$0xff] }
   0x7   :  { %442 = vmatpush.bf16.msra.mxu1 %v949_v3  ;;  %v955_v14 = vld [vmem:[%s1264_s1 + $0xa0] sm:$0xff]  ;;  %v954_v18 = vld [vmem:[%s1264_s1 + $0x98] sm:$0xff]  ;;  %v953_v22 = vld [vmem:[%s1264_s1 + $0x90] sm:$0xff] }
   0x8   :  { %455 = vmatpush.bf16.msra.mxu2 %v957_v6  ;;  %v963_v15 = vld [vmem:[%s1264_s1 + $0xe0] sm:$0xff]  ;;  %v962_v19 = vld [vmem:[%s1264_s1 + $0xd8] sm:$0xff]  ;;  %v961_v23 = vld [vmem:[%s1264_s1 + $0xd0] sm:$0xff] }
   0x9   :  { %468 = vmatpush.bf16.msra.mxu3 %v965_v7  ;;  %v936_v24 = vld [vmem:[%s1264_s1 + $0x8] sm:$0xff]  ;;  %v935_v27 = vld [vmem:[%s1264_s1] sm:$0xff]  ;;  %v974_v32 = vld [vmem:[%s1264_s1 + $0x138] sm:$0xff] }
   0xa   :  { %430 = vmatpush.bf16.msra.mxu0 %v940_v8  ;;  %v944_v25 = vld [vmem:[%s1264_s1 + $0x48] sm:$0xff]  ;;  %v943_v29 = vld [vmem:[%s1264_s1 + $0x40] sm:$0xff]  ;;  %v982_v33 = vld [vmem:[%s1264_s1 + $0x178] sm:$0xff] }
   0xb   :  { %443 = vmatpush.bf16.msra.mxu1 %v948_v9  ;;  %v952_v26 = vld [vmem:[%s1264_s1 + $0x88] sm:$0xff]  ;;  %v28_v30 = vld [vmem:[%s1266_s0] sm:$0xff]  ;;  %v30_v37 = vld [vmem:[%s1266_s0 + $0x10] sm:$0xff] }
   0xc   :  { %456 = vmatpush.bf16.msra.mxu2 %v956_v10  ;;  %v960_v28 = vld [vmem:[%s1264_s1 + $0xc8] sm:$0xff]  ;;  %v951_v34 = vld [vmem:[%s1264_s1 + $0x80] sm:$0xff]  ;;  %v34_v35 = vpack.c.bf16 %v28_v30, %v28_v30  ;;  %v31_v39 = vld [vmem:[%s1266_s0 + $0x18] sm:$0xff]  ;;  %v36_v42 = vpack.c.bf16 %v30_v37, %v30_v37 }
   0xd   :  { %469 = vmatpush.bf16.msra.mxu3 %v964_v11  ;;  %v29_v31 = vld [vmem:[%s1266_s0 + $0x8] sm:$0xff]  ;;  %v959_v38 = vld [vmem:[%s1264_s1 + $0xc0] sm:$0xff]  ;;  %v973_v40 = vld [vmem:[%s1264_s1 + $0x130] sm:$0xff]  ;;  %v37_v43 = vpack.c.bf16 %v31_v39, %v31_v39 }
   0xe   :  { %431 = vmatpush.bf16.msra.mxu0 %v939_v12  ;;  %v35_v36 = vpack.c.bf16 %v29_v31, %v29_v31  ;;  %v981_v41 = vld [vmem:[%s1264_s1 + $0x170] sm:$0xff]  ;;  %v972_v44 = vld [vmem:[%s1264_s1 + $0x128] sm:$0xff]  ;;  %v971_v46 = vld [vmem:[%s1264_s1 + $0x120] sm:$0xff] }
   0xf   :  { %444 = vmatpush.bf16.msra.mxu1 %v947_v13  ;;  %v980_v45 = vld [vmem:[%s1264_s1 + $0x168] sm:$0xff]  ;;  %v979_v47 = vld [vmem:[%s1264_s1 + $0x160] sm:$0xff]  ;;  %v970_v48 = vld [vmem:[%s1264_s1 + $0x118] sm:$0xff] }
  0x10   :  { %457 = vmatpush.bf16.msra.mxu2 %v955_v14  ;;  %v978_v49 = vld [vmem:[%s1264_s1 + $0x158] sm:$0xff]  ;;  %v969_v50 = vld [vmem:[%s1264_s1 + $0x110] sm:$0xff]  ;;  %v968_v52 = vld [vmem:[%s1264_s1 + $0x108] sm:$0xff] }
  0x11   :  { %470 = vmatpush.bf16.msra.mxu3 %v963_v15  ;;  %v977_v51 = vld [vmem:[%s1264_s1 + $0x150] sm:$0xff]  ;;  %v976_v53 = vld [vmem:[%s1264_s1 + $0x148] sm:$0xff]  ;;  %v967_v54 = vld [vmem:[%s1264_s1 + $0x100] sm:$0xff] }
  0x12   :  { %432 = vmatpush.bf16.msra.mxu0 %v938_v16  ;;  %v975_v55 = vld [vmem:[%s1264_s1 + $0x140] sm:$0xff]  ;;  %v33_v57 = vld [vmem:[%s1266_s0 + $0x28] sm:$0xff]  ;;  %v990_v60 = vld [vmem:[%s1268_s3 + $0x38] sm:$0xff] }
  0x13   :  { %445 = vmatpush.bf16.msra.mxu1 %v946_v17  ;;  %v32_v56 = vld [vmem:[%s1266_s0 + $0x20] sm:$0xff]  ;;  %v39_v59 = vpack.c.bf16 %v33_v57, %v33_v57  ;;  %v989_v61 = vld [vmem:[%s1268_s3 + $0x30] sm:$0xff]  ;;  %v988_v62 = vld [vmem:[%s1268_s3 + $0x28] sm:$0xff] }
  0x14   :  { %458 = vmatpush.bf16.msra.mxu2 %v954_v18  ;;  %v38_v58 = vpack.c.bf16 %v32_v56, %v32_v56  ;;  %v987_v63 = vld [vmem:[%s1268_s3 + $0x20] sm:$0xff]  ;;  %v986_v0 = vld [vmem:[%s1268_s3 + $0x18] sm:$0xff]  ;;  %v985_v1 = vld [vmem:[%s1268_s3 + $0x10] sm:$0xff] }
  0x15   :  { %471 = vmatpush.bf16.msra.mxu3 %v962_v19  ;;  %v984_v2 = vld [vmem:[%s1268_s3 + $0x8] sm:$0xff]  ;;  %v983_v5 = vld [vmem:[%s1268_s3] sm:$0xff]  ;;  %v998_v6 = vld [vmem:[%s1269_s5 + $0x38] sm:$0xff] }
  0x16   :  { %433 = vmatpush.bf16.msra.mxu0 %v937_v20  ;;  %v997_v9 = vld [vmem:[%s1269_s5 + $0x30] sm:$0xff]  ;;  %v999_v12 = vld [vmem:[%s1265_s2] ss:$0 sm:$0xff]  ;;  %v996_v13 = vld [vmem:[%s1269_s5 + $0x28] sm:$0xff] }
  0x17   :  { %446 = vmatpush.bf16.msra.mxu1 %v945_v21  ;;  %v995_v15 = vld [vmem:[%s1269_s5 + $0x20] sm:$0xff]  ;;  %v994_v19 = vld [vmem:[%s1269_s5 + $0x18] sm:$0xff]  ;;  %v993_v21 = vld [vmem:[%s1269_s5 + $0x10] sm:$0xff] }
  0x18   :  { %459 = vmatpush.bf16.msra.mxu2 %v953_v22  ;;  %v992_v31 = vld [vmem:[%s1269_s5 + $0x8] sm:$0xff] }
  0x19   :  { %472 = vmatpush.bf16.msra.mxu3 %v961_v23 }
  0x1a   :  { %434 = vmatpush.bf16.msra.mxu0 %v936_v24 }
  0x1b   :  { %447 = vmatpush.bf16.msra.mxu1 %v944_v25 }
  0x1c   :  { %460 = vmatpush.bf16.msra.mxu2 %v952_v26 }
  0x1d   :  { %473 = vmatpush.bf16.msra.mxu3 %v960_v28 }
  0x1e   :  { %435 = vmatpush.bf16.msra.mxu0 %v935_v27 }
  0x1f   :  { %448 = vmatpush.bf16.msra.mxu1 %v943_v29 }
  0x20   :  { %461 = vmatpush.bf16.msra.mxu2 %v951_v34  ;;  %v1000_v34 = vld [vmem:[%s1267_s4] ss:$0 sm:$0xff] }
  0x21   :  { %436 = vmatmul.bf16.vlgmr.msra.gmra.mxu0 %v34_v35  ;;  %474 = vmatpush.bf16.msra.mxu3 %v959_v38 }
  0x22   :  { %480 = vmatpush.bf16.msrb.mxu0 %v974_v32  ;;  %449 = vmatmul.bf16.vlgmr.msra.gmra.mxu1 %v35_v36  ;;  %v991_v32 = vld [vmem:[%s1269_s5] sm:$0xff] }
  0x23   :  { %493 = vmatpush.bf16.msrb.mxu1 %v982_v33  ;;  %462 = vmatmul.bf16.vlgmr.msra.gmra.mxu2 %v36_v42  ;;  %v12_v33 = vstv %s1270_s6 }
  0x24   :  { %475 = vmatmul.bf16.vlgmr.msra.gmra.mxu3 %v37_v43  ;;  %576 = vmatpush.bf16.msrb.mxu2 %v990_v60  ;;  %13 = vst [vmem:[#allocation2] sm:$0x1] %v12_v33 }
  0x25   :  { %655 = vmatpush.bf16.msrb.mxu3 %v998_v6 }
  0x26   :  { %481 = vmatpush.bf16.msrb.mxu0 %v973_v40 }
  0x27   :  { %494 = vmatpush.bf16.msrb.mxu1 %v981_v41 }
  0x28   :  { %577 = vmatpush.bf16.msrb.mxu2 %v989_v61 }
  0x29   :  { %656 = vmatpush.bf16.msrb.mxu3 %v997_v9 }
  0x2a   :  { %482 = vmatpush.bf16.msrb.mxu0 %v972_v44 }
  0x2b   :  { %495 = vmatpush.bf16.msrb.mxu1 %v980_v45  ;;  %v1001_v40 = vld [vmem:[#allocation2] ss:$0 sm:$0xff] }
  0x2c   :  { %578 = vmatpush.bf16.msrb.mxu2 %v988_v62 }
  0x2d   :  { %657 = vmatpush.bf16.msrb.mxu3 %v996_v13 }
  0x2e   :  { %483 = vmatpush.bf16.msrb.mxu0 %v971_v46 }
  0x2f   :  { %496 = vmatpush.bf16.msrb.mxu1 %v979_v47 }
  0x30   :  { %579 = vmatpush.bf16.msrb.mxu2 %v987_v63 }
  0x31   :  { %658 = vmatpush.bf16.msrb.mxu3 %v995_v15 }
  0x32   :  { %484 = vmatpush.bf16.msrb.mxu0 %v970_v48 }
  0x33   :  { %497 = vmatpush.bf16.msrb.mxu1 %v978_v49 }
  0x34   :  { %580 = vmatpush.bf16.msrb.mxu2 %v986_v0 }
  0x35   :  { %659 = vmatpush.bf16.msrb.mxu3 %v994_v19 }
  0x36   :  { %485 = vmatpush.bf16.msrb.mxu0 %v969_v50 }
  0x37   :  { %498 = vmatpush.bf16.msrb.mxu1 %v977_v51 }
  0x38   :  { %581 = vmatpush.bf16.msrb.mxu2 %v985_v1 }
  0x39   :  { %660 = vmatpush.bf16.msrb.mxu3 %v993_v21 }
  0x3a   :  { %486 = vmatpush.bf16.msrb.mxu0 %v968_v52 }
  0x3b   :  { %499 = vmatpush.bf16.msrb.mxu1 %v976_v53 }
  0x3c   :  { %582 = vmatpush.bf16.msrb.mxu2 %v984_v2 }
  0x3d   :  { %661 = vmatpush.bf16.msrb.mxu3 %v992_v31 }
  0x3e   :  { %487 = vmatpush.bf16.msrb.mxu0 %v967_v54 }
  0x3f   :  { %500 = vmatpush.bf16.msrb.mxu1 %v975_v55 }
  0x40   :  { %583 = vmatpush.bf16.msrb.mxu2 %v983_v5 }
  0x41   :  { %488 = vmatmul.bf16.vlgmr.msrb.gmra.mxu0 %v38_v58  ;;  %662 = vmatpush.bf16.msrb.mxu3 %v991_v32 }
  0x42   :  { %501 = vmatmul.bf16.vlgmr.msrb.gmra.mxu1 %v39_v59 }
  0x9e   :  { %v437_v3 = vpop.f32.mrf.mxu0 }
  0x9f   :  { %v450_v4 = vpop.f32.mrf.mxu1  ;;  %v438_v14 = vadd.f32 %v999_v12, %v437_v3 }
  0xa1   :  { %v451_v18 = vadd.f32 %v450_v4, %v438_v14 }
  0xa6   :  { %v439_v7 = vpop.f32.mrf.mxu0  ;;  %v463_v10 = vpop.f32.mrf.mxu2 }
  0xa7   :  { %v452_v8 = vpop.f32.mrf.mxu1  ;;  %v476_v11 = vpop.f32.mrf.mxu3  ;;  %v464_v20 = vadd.f32 %v463_v10, %v451_v18 }
  0xa9   :  { %v477_v22 = vadd.f32 %v476_v11, %v464_v20 }
  0xae   :  { %v465_v16 = vpop.f32.mrf.mxu2 }
  0xaf   :  { %v478_v17 = vpop.f32.mrf.mxu3 }
  0xbe   :  { %v489_v23 = vpop.f32.mrf.mxu0 }
  0xbf   :  { %v502_v24 = vpop.f32.mrf.mxu1  ;;  %v490_v25 = vadd.f32 %v489_v23, %v477_v22 }
  0xc1   :  { %v503_v26 = vadd.f32 %v502_v24, %v490_v25 }
  0xc3   :  { %v506_v27 = vmax.f32 %v503_v26, 0.0 }
  0xc5   :  { %v507_v28 = vpack.c.bf16 %v506_v27, %v506_v27 }
  0xc6   :  { %v491_v29 = vpop.f32.mrf.mxu0 }
  0xc7   :  { %v504_v30 = vpop.f32.mrf.mxu1  ;;  %584 = vmatmul.bf16.vlgmr.msrb.gmra.mxu2 %v507_v28 }
 0x14a   :  { %v585_v35 = vpop.f32.mrf.mxu2 }
 0x14b   :  { %v586_v36 = vadd.f32 %v1000_v34, %v585_v35 }
 0x14d   :  { %v589_v37 = vmax.f32 %v586_v36, 0.0 }
 0x14f   :  { %v590_v38 = vpack.c.bf16 %v589_v37, %v589_v37 }
 0x151   :  { %663 = vmatmul.bf16.vlgmr.msrb.gmra.mxu3 %v590_v38 }
 0x152   :  { %v587_v39 = vpop.f32.mrf.mxu2 }
 0x1d4   :  { %v664_v41 = vpop.f32.mrf.mxu3 }
 0x1d5   :  { %v672_v42 = vadd.f32 %v1001_v40, %v664_v41 }
 0x1d7   :  { %674 = vst.msk [vmem:[%s1271_s7] sm:$0xff] %vm673_vm0, %v672_v42 }
 0x1dc   :  { %v666_v43 = vpop.f32.mrf.mxu3 }

</bundles_post_ra>
